<compile_context>
chip_gen: v6e
topology: v6e:2x2x1
jax: 0.10.0
libtpu: 0.0.40
codegen_flags: <defaults>
</compile_context>

<pallas_src>
import jax
import jax.numpy as jnp
from jax import lax
from jax.experimental import pallas as pl
from jax.experimental.pallas import tpu as pltpu

# ---- "meta" values (stand-in for pickle.load('models/bert.args')) ----
D_MODEL    = 32   # d_model
MAX_LEN    = 16   # max_len
N_SEGMENTS = 2    # n_segments
VOCAB_SIZE = 32   # vocab_size
LN_EPS     = 1e-5


def _make_embedding_kernel(window: int, eps: float):
    """Kernel factory; `window` = number of in-flight gather DMAs (static)."""

    def kernel(tok_ids_ref,      # SMEM (n_pad,) int32           (scalar prefetch)
               seg_ids_ref,      # VMEM (R, 1)   int32
               tok_hbm_ref,      # HBM  (V, D)                    (memory_space=ANY)
               pos_blk_ref,      # VMEM (R, D)   grid-invariant slab
               seg_tab_ref,      # VMEM (G, D)   grid-invariant
               gamma_ref,        # VMEM (1, D)   grid-invariant
               beta_ref,         # VMEM (1, D)   grid-invariant
               out_ref,          # VMEM (R, D)
               gbuf_ref,         # VMEM (R, D)   scratch: gathered token rows
               sem_ref):         # DMA semaphores (window,)
        R, D = out_ref.shape
        base = pl.program_id(0) * R

        def start_row(r):
            tid = tok_ids_ref[base + r]
            pltpu.make_async_copy(
                tok_hbm_ref.at[pl.ds(tid, 1), :],
                gbuf_ref.at[pl.ds(r, 1), :],
                sem_ref.at[r % window]).start()

        def wait_row(r):
            pltpu.make_async_copy(
                tok_hbm_ref.at[pl.ds(0, 1), :],     # same-shape descriptor
                gbuf_ref.at[pl.ds(r, 1), :],
                sem_ref.at[r % window]).wait()

        # --- HBM row gather: keep `window` DMAs in flight --------------------
        @pl.loop(0, min(window, R))
        def _(r):
            start_row(r)

        @pl.loop(0, R)
        def _(r):
            wait_row(r)

            @pl.when(r + window < R)
            def _():
                start_row(r + window)

        # --- embedding sum (pure VPU adds; no MXU work) -----------------------
        emb = gbuf_ref[...].astype(jnp.float32)
        emb = emb + pos_blk_ref[...].astype(jnp.float32)

        sids = seg_ids_ref[...]                                    # (R, 1) int32
        seg_rows = seg_tab_ref[...].astype(jnp.float32)            # (G, D) tiny
        G = seg_rows.shape[0]
        if G == 1:
            seg_emb = jnp.broadcast_to(seg_rows[0:1, :], (R, D))
        elif G == 2:
            seg_emb = jnp.where(sids == 0, seg_rows[0:1, :], seg_rows[1:2, :])
        else:
            seg_emb = jnp.broadcast_to(seg_rows[0:1, :], (R, D))
            for g in range(1, G):                                  # static, small
                seg_emb = jnp.where(sids == g, seg_rows[g:g + 1, :], seg_emb)
        emb = emb + seg_emb

        # --- fused LayerNorm over D (two-pass centered form; rsqrt on EUP) ---
        inv_d = jnp.float32(1.0 / D)
        mean = jnp.sum(emb, axis=-1, keepdims=True) * inv_d
        centered = emb - mean
        var = jnp.sum(centered * centered, axis=-1, keepdims=True) * inv_d
        scale = lax.rsqrt(var + jnp.float32(eps))                  # (R, 1)
        y = centered * (scale * gamma_ref[...].astype(jnp.float32)) \
            + beta_ref[...].astype(jnp.float32)
        out_ref[...] = y.astype(out_ref.dtype)

    return kernel


def _choose_rows_per_block(B, S, target_rows=512):
    """Whole sequences per block, ~target_rows rows, >= 2 blocks when B >= 2."""
    spb = max(1, min(B, target_rows // max(S, 1)))
    if B >= 2:
        spb = min(spb, (B + 1) // 2)          # >= 2 grid blocks -> both v7x TCs busy
    while spb < B and (spb * S) % 8 != 0:     # keep row blocks sublane-aligned
        spb += 1
    if (spb * S) % 8 != 0:
        spb = B                               # single full-extent block (always legal)
    return spb


def embedding_forward(x, seg, tok_table, pos_table, seg_table, gamma, beta,
                      *, eps=LN_EPS, target_rows=512):
    """x, seg: (B, S) int32.  Returns (B, S, D) in tok_table.dtype."""
    B, S = x.shape
    V, D = tok_table.shape
    G = seg_table.shape[0]
    assert S <= pos_table.shape[0], "sequence length exceeds max_len"
    out_dtype = tok_table.dtype

    spb = _choose_rows_per_block(B, S, target_rows)
    row_block = spb * S                        # rows per grid step (seq-aligned)
    n_rows = B * S
    num_blocks = pl.cdiv(B, spb)
    n_pad = num_blocks * row_block

    tok_ids = x.astype(jnp.int32).reshape(n_rows)          # -> SMEM (scalar prefetch)
    seg_ids = seg.astype(jnp.int32).reshape(n_rows, 1)
    if n_pad > n_rows:
        tok_ids = jnp.pad(tok_ids, (0, n_pad - n_rows))    # id 0 = valid gather row
        seg_ids = jnp.pad(seg_ids, ((0, n_pad - n_rows), (0, 0)))

    # Grid-invariant constants (constant index_map -> fetched once, stay resident).
    pos_block = jnp.tile(pos_table[:S], (spb, 1))           # (row_block, D)
    gamma2 = gamma.reshape(1, D)
    beta2 = beta.reshape(1, D)

    window = max(1, min(16, row_block))                     # in-flight gather DMAs

    # --- generation-aware VMEM budget (constants counted once) --------------
    def _nb(shape, itemsize):
        n = itemsize
        for d in shape:
            n *= d
        return n

    tab_isz = jnp.dtype(tok_table.dtype).itemsize
    out_isz = jnp.dtype(out_dtype).itemsize
    const_bytes = (_nb((row_block, D), jnp.dtype(pos_block.dtype).itemsize)
                   + _nb((G, D), tab_isz) + 2 * _nb((1, D), 4))
    step_bytes = _nb((row_block, 1), 4) + _nb((row_block, D), out_isz)
    scratch_bytes = _nb((row_block, D), tab_isz)
    est = const_bytes + 2 * step_bytes + scratch_bytes       # double-buffered steps
    try:
        cap = pltpu.get_tpu_info().vmem_capacity_bytes       # 64 MiB v7x, 128 MiB v5e/v6e
    except Exception:
        cap = 64 << 20                                       # conservative fallback
    vmem_limit = int(min(cap * 3 // 4, max(4 * est, 16 << 20)))

    grid_spec = pltpu.PrefetchScalarGridSpec(
        num_scalar_prefetch=1,                               # token ids -> SMEM
        grid=(num_blocks,),
        in_specs=[
            pl.BlockSpec((row_block, 1), lambda i, tok: (i, 0)),   # segment ids
            pl.BlockSpec(memory_space=pl.ANY),                     # token table (HBM)
            pl.BlockSpec((row_block, D), lambda i, tok: (0, 0)),   # position slab
            pl.BlockSpec((G, D), lambda i, tok: (0, 0)),           # segment table
            pl.BlockSpec((1, D), lambda i, tok: (0, 0)),           # gamma
            pl.BlockSpec((1, D), lambda i, tok: (0, 0)),           # beta
        ],
        out_specs=pl.BlockSpec((row_block, D), lambda i, tok: (i, 0)),
        scratch_shapes=[
            pltpu.VMEM((row_block, D), tok_table.dtype),     # gathered token rows
            pltpu.SemaphoreType.DMA((window,)),
        ],
    )

    out = pl.pallas_call(
        _make_embedding_kernel(window=window, eps=float(eps)),
        out_shape=jax.ShapeDtypeStruct((n_pad, D), out_dtype),
        grid_spec=grid_spec,
        compiler_params=pltpu.CompilerParams(
            dimension_semantics=("parallel",),               # row-block axis -> megacore
            vmem_limit_bytes=vmem_limit),
    )(tok_ids, seg_ids, tok_table, pos_block, seg_table, gamma2, beta2)

    return out[:n_rows].reshape(B, S, D)


def embedding_reference(x, seg, tok_table, pos_table, seg_table, gamma, beta):
    """Pure-JAX reference mirroring the PyTorch forward."""
    B, S = x.shape
    pos = jnp.arange(S)
    emb = tok_table[x] + pos_table[pos][None, :, :] + seg_table[seg]
    mean = emb.mean(-1, keepdims=True)
    var = ((emb - mean) ** 2).mean(-1, keepdims=True)
    return (emb - mean) / jnp.sqrt(var + LN_EPS) * gamma + beta


if __name__ == "__main__":
    key = jax.random.PRNGKey(0)
    k_tok, k_pos, k_seg, k_x, k_s = jax.random.split(key, 5)

    B, S = 2, 8

    tok_table = jax.random.normal(k_tok, (VOCAB_SIZE, D_MODEL), dtype=jnp.float32)
    pos_table = jax.random.normal(k_pos, (MAX_LEN, D_MODEL), dtype=jnp.float32)
    seg_table = jax.random.normal(k_seg, (N_SEGMENTS, D_MODEL), dtype=jnp.float32)
    gamma = jnp.ones((D_MODEL,), dtype=jnp.float32)
    beta = jnp.zeros((D_MODEL,), dtype=jnp.float32)

    x = jax.random.randint(k_x, (B, S), 0, VOCAB_SIZE, dtype=jnp.int32)
    seg = jax.random.randint(k_s, (B, S), 0, N_SEGMENTS, dtype=jnp.int32)

    out = embedding_forward(x, seg, tok_table, pos_table, seg_table, gamma, beta)
    out = jax.block_until_ready(out)

    ref = embedding_reference(x, seg, tok_table, pos_table, seg_table, gamma, beta)
    assert out.shape == (B, S, D_MODEL)
    assert jnp.allclose(out, ref, atol=1e-4, rtol=1e-4)

    print("KERNEL_OK")
</pallas_src>

<mosaic_0001>
module attributes {stable_mosaic.version = 11 : i64} {
  func.func @kernel(%arg0: i32, %arg1: memref<16xi32, #tpu.memory_space<smem>>, %arg2: memref<8x1xi32, #tpu.memory_space<vmem>>, %arg3: memref<32x32xf32, #tpu.memory_space<any>>, %arg4: memref<8x32xf32, #tpu.memory_space<vmem>>, %arg5: memref<2x32xf32, #tpu.memory_space<vmem>>, %arg6: memref<1x32xf32, #tpu.memory_space<vmem>>, %arg7: memref<1x32xf32, #tpu.memory_space<vmem>>, %arg8: memref<8x32xf32, #tpu.memory_space<vmem>>, %arg9: memref<8x32xf32, #tpu.memory_space<vmem>>, %arg10: memref<8x!tpu.dma_semaphore, #tpu.memory_space<semaphore_mem>>) attributes {dimension_semantics = [#tpu.dimension_semantics<parallel>], iteration_bounds = array<i64: 2>, scalar_prefetch = 1 : i64, scratch_operands = 2 : i64, tpu.core_type = #tpu.core_type<tc>, window_params = [{transform_indices = @transform_0, window_bounds = array<i64: 8, 1>}, {}, {pipeline_mode = #tpu.pipeline_mode<synchronous>, transform_indices = @transform_2, window_bounds = array<i64: 8, 32>}, {pipeline_mode = #tpu.pipeline_mode<synchronous>, transform_indices = @transform_3, window_bounds = array<i64: 2, 32>}, {pipeline_mode = #tpu.pipeline_mode<synchronous>, transform_indices = @transform_4, window_bounds = array<i64: 1, 32>}, {pipeline_mode = #tpu.pipeline_mode<synchronous>, transform_indices = @transform_5, window_bounds = array<i64: 1, 32>}, {transform_indices = @transform_6, window_bounds = array<i64: 8, 32>}]} {
    %c8_i32 = arith.constant 8 : i32
    %0 = arith.muli %arg0, %c8_i32 : i32
    %c0_i32 = arith.constant 0 : i32
    %c8_i32_0 = arith.constant 8 : i32
    %1 = arith.addi %c0_i32, %c8_i32_0 : i32
    %c1_i32 = arith.constant 1 : i32
    scf.for %arg11 = %c0_i32 to %1 step %c1_i32  : i32 {
      %c1_i32_24 = arith.constant 1 : i32
      %43 = arith.muli %arg11, %c1_i32_24 : i32
      %c0_i32_25 = arith.constant 0 : i32
      %44 = arith.addi %c0_i32_25, %43 : i32
      %45 = arith.addi %0, %44 : i32
      %46 = arith.index_cast %45 : i32 to index
      %47 = memref.load %arg1[%46] : memref<16xi32, #tpu.memory_space<smem>>
      %c8_i32_26 = arith.constant 8 : i32
      %c0_i32_27 = arith.constant 0 : i32
      %48 = arith.cmpi eq, %c8_i32_26, %c0_i32_27 : i32
      %c1_i32_28 = arith.constant 1 : i32
      %49 = arith.select %48, %c1_i32_28, %c8_i32_26 : i32
      %50 = arith.remsi %44, %49 : i32
      %c0_i32_29 = arith.constant 0 : i32
      %51 = arith.cmpi ne, %50, %c0_i32_29 : i32
      %c0_i32_30 = arith.constant 0 : i32
      %52 = arith.cmpi slt, %50, %c0_i32_30 : i32
      %c0_i32_31 = arith.constant 0 : i32
      %53 = arith.cmpi slt, %49, %c0_i32_31 : i32
      %54 = arith.xori %52, %53 : i1
      %55 = arith.andi %54, %51 : i1
      %56 = arith.addi %50, %49 : i32
      %57 = arith.select %55, %56, %50 : i32
      %c0_i32_32 = arith.constant 0 : i32
      %58 = tpu.memref_slice %arg3[%47, %c0_i32_32] : memref<32x32xf32, #tpu.memory_space<any>> -> memref<1x32xf32, #tpu.memory_space<any>>
      %c0_i32_33 = arith.constant 0 : i32
      %59 = tpu.memref_slice %arg9[%44, %c0_i32_33] : memref<8x32xf32, #tpu.memory_space<vmem>> -> memref<1x32xf32, #tpu.memory_space<vmem>>
      %60 = tpu.memref_slice %arg10[%57] : memref<8x!tpu.dma_semaphore, #tpu.memory_space<semaphore_mem>> -> memref<1x!tpu.dma_semaphore, #tpu.memory_space<semaphore_mem>>
      %61 = tpu.memref_squeeze %60 : memref<1x!tpu.dma_semaphore, #tpu.memory_space<semaphore_mem>> -> memref<!tpu.dma_semaphore, #tpu.memory_space<semaphore_mem>>
      tpu.enqueue_dma source(%58 : memref<1x32xf32, #tpu.memory_space<any>>) target(%59 : memref<1x32xf32, #tpu.memory_space<vmem>>) target_semaphore(%61 : memref<!tpu.dma_semaphore, #tpu.memory_space<semaphore_mem>>)
    }
    %c8_i32_1 = arith.constant 8 : i32
    %c0_i32_2 = arith.constant 0 : i32
    %c8_i32_3 = arith.constant 8 : i32
    %2 = arith.addi %c0_i32_2, %c8_i32_3 : i32
    %c1_i32_4 = arith.constant 1 : i32
    scf.for %arg11 = %c0_i32_2 to %2 step %c1_i32_4  : i32 {
      %c1_i32_24 = arith.constant 1 : i32
      %43 = arith.muli %arg11, %c1_i32_24 : i32
      %c0_i32_25 = arith.constant 0 : i32
      %44 = arith.addi %c0_i32_25, %43 : i32
      %c8_i32_26 = arith.constant 8 : i32
      %c0_i32_27 = arith.constant 0 : i32
      %45 = arith.cmpi eq, %c8_i32_26, %c0_i32_27 : i32
      %c1_i32_28 = arith.constant 1 : i32
      %46 = arith.select %45, %c1_i32_28, %c8_i32_26 : i32
      %47 = arith.remsi %44, %46 : i32
      %c0_i32_29 = arith.constant 0 : i32
      %48 = arith.cmpi ne, %47, %c0_i32_29 : i32
      %c0_i32_30 = arith.constant 0 : i32
      %49 = arith.cmpi slt, %47, %c0_i32_30 : i32
      %c0_i32_31 = arith.constant 0 : i32
      %50 = arith.cmpi slt, %46, %c0_i32_31 : i32
      %51 = arith.xori %49, %50 : i1
      %52 = arith.andi %51, %48 : i1
      %53 = arith.addi %47, %46 : i32
      %54 = arith.select %52, %53, %47 : i32
      %c0_i32_32 = arith.constant 0 : i32
      %c0_i32_33 = arith.constant 0 : i32
      %55 = tpu.memref_slice %arg3[%c0_i32_32, %c0_i32_33] : memref<32x32xf32, #tpu.memory_space<any>> -> memref<1x32xf32, #tpu.memory_space<any>>
      %c0_i32_34 = arith.constant 0 : i32
      %56 = tpu.memref_slice %arg9[%44, %c0_i32_34] : memref<8x32xf32, #tpu.memory_space<vmem>> -> memref<1x32xf32, #tpu.memory_space<vmem>>
      %57 = tpu.memref_slice %arg10[%54] : memref<8x!tpu.dma_semaphore, #tpu.memory_space<semaphore_mem>> -> memref<1x!tpu.dma_semaphore, #tpu.memory_space<semaphore_mem>>
      %58 = tpu.memref_squeeze %57 : memref<1x!tpu.dma_semaphore, #tpu.memory_space<semaphore_mem>> -> memref<!tpu.dma_semaphore, #tpu.memory_space<semaphore_mem>>
      tpu.wait_dma2 semaphore(%58 : memref<!tpu.dma_semaphore, #tpu.memory_space<semaphore_mem>>) src(%55 : memref<1x32xf32, #tpu.memory_space<any>>) dst(%56 : memref<1x32xf32, #tpu.memory_space<vmem>>)
      %c8_i32_35 = arith.constant 8 : i32
      %59 = arith.addi %44, %c8_i32_35 : i32
      %c8_i32_36 = arith.constant 8 : i32
      %60 = arith.cmpi slt, %59, %c8_i32_36 : i32
      %61 = arith.extui %60 : i1 to i32
      %c0_i32_37 = arith.constant 0 : i32
      %62 = arith.cmpi ne, %61, %c0_i32_37 : i32
      scf.if %62 {
        %c8_i32_38 = arith.constant 8 : i32
        %63 = arith.addi %44, %c8_i32_38 : i32
        %64 = arith.addi %0, %63 : i32
        %65 = arith.index_cast %64 : i32 to index
        %66 = memref.load %arg1[%65] : memref<16xi32, #tpu.memory_space<smem>>
        %c8_i32_39 = arith.constant 8 : i32
        %c0_i32_40 = arith.constant 0 : i32
        %67 = arith.cmpi eq, %c8_i32_39, %c0_i32_40 : i32
        %c1_i32_41 = arith.constant 1 : i32
        %68 = arith.select %67, %c1_i32_41, %c8_i32_39 : i32
        %69 = arith.remsi %63, %68 : i32
        %c0_i32_42 = arith.constant 0 : i32
        %70 = arith.cmpi ne, %69, %c0_i32_42 : i32
        %c0_i32_43 = arith.constant 0 : i32
        %71 = arith.cmpi slt, %69, %c0_i32_43 : i32
        %c0_i32_44 = arith.constant 0 : i32
        %72 = arith.cmpi slt, %68, %c0_i32_44 : i32
        %73 = arith.xori %71, %72 : i1
        %74 = arith.andi %73, %70 : i1
        %75 = arith.addi %69, %68 : i32
        %76 = arith.select %74, %75, %69 : i32
        %c0_i32_45 = arith.constant 0 : i32
        %77 = tpu.memref_slice %arg3[%66, %c0_i32_45] : memref<32x32xf32, #tpu.memory_space<any>> -> memref<1x32xf32, #tpu.memory_space<any>>
        %c0_i32_46 = arith.constant 0 : i32
        %78 = tpu.memref_slice %arg9[%63, %c0_i32_46] : memref<8x32xf32, #tpu.memory_space<vmem>> -> memref<1x32xf32, #tpu.memory_space<vmem>>
        %79 = tpu.memref_slice %arg10[%76] : memref<8x!tpu.dma_semaphore, #tpu.memory_space<semaphore_mem>> -> memref<1x!tpu.dma_semaphore, #tpu.memory_space<semaphore_mem>>
        %80 = tpu.memref_squeeze %79 : memref<1x!tpu.dma_semaphore, #tpu.memory_space<semaphore_mem>> -> memref<!tpu.dma_semaphore, #tpu.memory_space<semaphore_mem>>
        tpu.enqueue_dma source(%77 : memref<1x32xf32, #tpu.memory_space<any>>) target(%78 : memref<1x32xf32, #tpu.memory_space<vmem>>) target_semaphore(%80 : memref<!tpu.dma_semaphore, #tpu.memory_space<semaphore_mem>>)
      } else {
      }
    }
    %c8_i32_5 = arith.constant 8 : i32
    %c0 = arith.constant 0 : index
    %c0_6 = arith.constant 0 : index
    %3 = vector.load %arg9[%c0, %c0_6] : memref<8x32xf32, #tpu.memory_space<vmem>>, vector<8x32xf32>
    %c0_7 = arith.constant 0 : index
    %c0_8 = arith.constant 0 : index
    %4 = vector.load %arg4[%c0_7, %c0_8] : memref<8x32xf32, #tpu.memory_space<vmem>>, vector<8x32xf32>
    %5 = arith.addf %3, %4 : vector<8x32xf32>
    %c0_9 = arith.constant 0 : index
    %c0_10 = arith.constant 0 : index
    %6 = vector.load %arg2[%c0_9, %c0_10] : memref<8x1xi32, #tpu.memory_space<vmem>>, vector<8x1xi32>
    %c0_11 = arith.constant 0 : index
    %c0_12 = arith.constant 0 : index
    %7 = vector.load %arg5[%c0_11, %c0_12] : memref<2x32xf32, #tpu.memory_space<vmem>>, vector<2x32xf32>
    %c0_i32_13 = arith.constant 0 : i32
    %8 = vector.broadcast %c0_i32_13 : i32 to vector<8x1xi32>
    %9 = arith.cmpi eq, %6, %8 : vector<8x1xi32>
    %10 = vector.extract_strided_slice %7 {offsets = [0, 0], sizes = [1, 32], strides = [1, 1]} : vector<2x32xf32> to vector<1x32xf32>
    %11 = vector.extract_strided_slice %7 {offsets = [1, 0], sizes = [1, 32], strides = [1, 1]} : vector<2x32xf32> to vector<1x32xf32>
    %12 = vector.shape_cast %9 : vector<8x1xi1> to vector<8x1xi1>
    %13 = vector.broadcast %12 : vector<8x1xi1> to vector<8x32xi1>
    %14 = vector.shape_cast %10 : vector<1x32xf32> to vector<1x32xf32>
    %15 = vector.broadcast %14 : vector<1x32xf32> to vector<8x32xf32>
    %16 = vector.shape_cast %11 : vector<1x32xf32> to vector<1x32xf32>
    %17 = vector.broadcast %16 : vector<1x32xf32> to vector<8x32xf32>
    %18 = arith.select %13, %15, %17 : vector<8x32xi1>, vector<8x32xf32>
    %19 = arith.addf %5, %18 : vector<8x32xf32>
    %cst = arith.constant dense<0.000000e+00> : vector<8xf32>
    %20 = vector.multi_reduction <add>, %19, %cst [1] : vector<8x32xf32> to vector<8xf32>
    %21 = vector.shape_cast %20 : vector<8xf32> to vector<8x1xf32>
    %cst_14 = arith.constant 3.125000e-02 : f32
    %22 = vector.broadcast %cst_14 : f32 to vector<8x1xf32>
    %23 = arith.mulf %21, %22 : vector<8x1xf32>
    %24 = vector.broadcast %23 : vector<8x1xf32> to vector<8x32xf32>
    %25 = arith.subf %19, %24 : vector<8x32xf32>
    %26 = arith.mulf %25, %25 : vector<8x32xf32>
    %cst_15 = arith.constant dense<0.000000e+00> : vector<8xf32>
    %27 = vector.multi_reduction <add>, %26, %cst_15 [1] : vector<8x32xf32> to vector<8xf32>
    %28 = vector.shape_cast %27 : vector<8xf32> to vector<8x1xf32>
    %cst_16 = arith.constant 3.125000e-02 : f32
    %29 = vector.broadcast %cst_16 : f32 to vector<8x1xf32>
    %30 = arith.mulf %28, %29 : vector<8x1xf32>
    %cst_17 = arith.constant 9.99999974E-6 : f32
    %31 = vector.broadcast %cst_17 : f32 to vector<8x1xf32>
    %32 = arith.addf %30, %31 : vector<8x1xf32>
    %33 = math.rsqrt %32 : vector<8x1xf32>
    %c0_18 = arith.constant 0 : index
    %c0_19 = arith.constant 0 : index
    %34 = vector.load %arg6[%c0_18, %c0_19] : memref<1x32xf32, #tpu.memory_space<vmem>>, vector<1x32xf32>
    %35 = vector.broadcast %33 : vector<8x1xf32> to vector<8x32xf32>
    %36 = vector.broadcast %34 : vector<1x32xf32> to vector<8x32xf32>
    %37 = arith.mulf %35, %36 : vector<8x32xf32>
    %38 = arith.mulf %25, %37 : vector<8x32xf32>
    %c0_20 = arith.constant 0 : index
    %c0_21 = arith.constant 0 : index
    %39 = vector.load %arg7[%c0_20, %c0_21] : memref<1x32xf32, #tpu.memory_space<vmem>>, vector<1x32xf32>
    %40 = vector.broadcast %39 : vector<1x32xf32> to vector<8x32xf32>
    %41 = arith.addf %38, %40 : vector<8x32xf32>
    %c0_22 = arith.constant 0 : index
    %c0_23 = arith.constant 0 : index
    %42 = vector.load %arg8[%c0_22, %c0_23] : memref<8x32xf32, #tpu.memory_space<vmem>>, vector<8x32xf32>
    tpu.vector_store %arg8[%c0_22, %c0_23], %41 {strides = array<i32>} : memref<8x32xf32, #tpu.memory_space<vmem>>, vector<8x32xf32>,
    return
  }
  func.func @transform_0(%arg0: i32, %arg1: memref<16xi32, #tpu.memory_space<smem>>) -> (i32, i32) {
    %c0_i32 = arith.constant 0 : i32
    %c0_i32_0 = arith.constant 0 : i32
    return %arg0, %c0_i32 : i32, i32
  }
  func.func @transform_2(%arg0: i32, %arg1: memref<16xi32, #tpu.memory_space<smem>>) -> (i32, i32) {
    %c0_i32 = arith.constant 0 : i32
    %c0_i32_0 = arith.constant 0 : i32
    %c0_i32_1 = arith.constant 0 : i32
    return %c0_i32, %c0_i32_0 : i32, i32
  }
  func.func @transform_3(%arg0: i32, %arg1: memref<16xi32, #tpu.memory_space<smem>>) -> (i32, i32) {
    %c0_i32 = arith.constant 0 : i32
    %c0_i32_0 = arith.constant 0 : i32
    %c0_i32_1 = arith.constant 0 : i32
    return %c0_i32, %c0_i32_0 : i32, i32
  }
  func.func @transform_4(%arg0: i32, %arg1: memref<16xi32, #tpu.memory_space<smem>>) -> (i32, i32) {
    %c0_i32 = arith.constant 0 : i32
    %c0_i32_0 = arith.constant 0 : i32
    %c0_i32_1 = arith.constant 0 : i32
    return %c0_i32, %c0_i32_0 : i32, i32
  }
  func.func @transform_5(%arg0: i32, %arg1: memref<16xi32, #tpu.memory_space<smem>>) -> (i32, i32) {
    %c0_i32 = arith.constant 0 : i32
    %c0_i32_0 = arith.constant 0 : i32
    %c0_i32_1 = arith.constant 0 : i32
    return %c0_i32, %c0_i32_0 : i32, i32
  }
  func.func @transform_6(%arg0: i32, %arg1: memref<16xi32, #tpu.memory_space<smem>>) -> (i32, i32) {
    %c0_i32 = arith.constant 0 : i32
    %c0_i32_0 = arith.constant 0 : i32
    return %arg0, %c0_i32 : i32, i32
  }
}

</mosaic_0001>

<bundles_post_ra>
// kernel: tpu_custom_call.1
= control target key start
LH: loop header
LB: loop body
LE: loop exit
PB: predicated region body
PF: predicated region fallthrough
CT: control target
= control target key end

     0   :  { %s1003_s0 = inlined_call_operand.vmem [shape: s32[16], index: 0, kind: input, shape index: {}]   ;;  %s1004_s1 = inlined_call_operand.vmem [shape: s32[16,1], index: 1, kind: input, shape index: {}]   ;;  %s1005_s2 = inlined_call_operand.hbm [shape: f32[32,32], index: 2, kind: input, shape index: {}]   ;;  %s1006_s3 = inlined_call_operand.vmem [shape: f32[8,32], index: 3, kind: input, shape index: {}]   ;;  %s1007_s4 = inlined_call_operand.vmem [shape: f32[2,32], index: 4, kind: input, shape index: {}]   ;;  %s1008_s5 = inlined_call_operand.vmem [shape: f32[1,32], index: 5, kind: input, shape index: {}]   ;;  %s1009_s6 = inlined_call_operand.vmem [shape: f32[1,32], index: 6, kind: input, shape index: {}]   ;;  %s1010_s7 = inlined_call_operand.hbm [shape: f32[16,32], index: 7, kind: output, shape index: {}]  }
   0x1   :  { %1020 = sst [smem:[#allocation24_spill]] %s1004_s1  ;;  %s12_s26 = sshll.u32 %s1003_s0, 4  ;;  %s13_s26 = int_to_ptr.vmem [resolvable:$true] %s12_s26 }
   0x2   :  { %s618_s27 = scalar_lea.vmem %s13_s26, 16  ;;  %p623_p1 = scmp.lt.s32.totalorder %s13_s26, %s13_s26 }
   0x3   :  { %p619_p0 = scmp.ne.s32.totalorder %s13_s26, %s618_s27  ;;  %p624_p2 = scmp.lt.s32.totalorder %s618_s27, %s618_s27 }
   0x5   :  { %p625_p3 = por %p624_p2, %p623_p1 }
   0x7   :  { %p626_p4 = pnand %p625_p3, %p619_p0 }
   0x9   :  { %629 = shalt.err (!%p626_p4)  }
   0xa   :  { %s760_s28 = smov [#allocation5]  }
   0xb   :  { %15 = dma.vmem_to_smem %s13_s26, 16, %s760_s28, [#allocation4] }
   0xc   :  { %728 = dma.done.wait [#allocation4], 16 }
   0xd   :  { %729 = vsyncadd [#allocation4], 4294967280 }
   0xe   :  { %17 = sfence }
   0xf   :  { %18 = vsyncpa [#allocation7], 0 }
  0x10   :  { %20 = vsyncpa [#allocation7 + $0x1], 0  ;;  %s807_s29 = smov 0   ;;  %s809_s30 = smov 0  }
  0x11   :  { %s811_s0 = smov 0   ;;  %s813_s8 = smov 0  }
  0x12 LB: > { %1021 = sst [smem:[#allocation18_spill]] %s738_s29  ;;  %s828_s9 = sadd.s32 4294967295, %s750_s8   ;;  %s750_s8 = sphi %s813_s8, %s1041_s8   ;;  %s746_s0 = sphi %s811_s0, %s1046_s0   ;;  %s742_s30 = sphi %s809_s30, %s1045_s30   ;;  %s738_s29 = sphi %s807_s29, %s1044_s29  }
  0x13   : > { %1022 = sst [smem:[#allocation19_spill]] %s746_s0  ;;  %s520_s10 = sadd.s32 4294967294, %s750_s8  }
  0x14   : > { %1023 = sst [smem:[#allocation20_spill]] %s750_s8  ;;  %s832_s11 = sadd.s32 1, %s750_s8  }
  0x15   : > { %1024 = sst [smem:[#allocation21_spill]] %s832_s11  ;;  %s143_s12 = sadd.s32 1, %s746_s0 }
  0x16   : > { %s140_s13 = ssub.s32 %s750_s8, %s832_s11  ;;  %p153_p5 = scmp.ne.s32.totalorder %s746_s0, %s742_s30 }
  0x17   : > { %p141_p6 = scmp.eq.s32.totalorder %s140_s13, 0  ;;  %p154_p7 = scmp.eq.s32.totalorder %s828_s9, 1 }
  0x18   : > { %p159_p8 = scmp.ne.s32.totalorder %s742_s30, %s738_s29  ;;  %p160_p9 = scmp.eq.s32.totalorder %s520_s10, 1 }
  0x19   : > { %s843_s14 = scalar_select %p141_p6, %s746_s0, %s143_s12  }
  0x1a   : > { %p845_p10 = por %p154_p7, %p153_p5  ;;  %p849_p11 = por %p160_p9, %p159_p8 }
  0x1b   : > { %1025 = sst [smem:[#allocation22_spill]] %s843_s14  ;;  %p523_p12 = scmp.ge.s32.totalorder %s750_s8, 1 }
  0x1c   : > { %s1027_s16 = scalar_select %p849_p11, 1, 0 }
  0x1d   : > { %p197_p13 = scmp.lt.s32.totalorder %s750_s8, 3 }
  0x1e   : > { %1028 = sst [smem:[#allocation23_spill]] %s1027_s16 }
  0x1f   : > { %p198_p0 = pnand %p523_p12, %p197_p13 }
  0x20   : > { %s1011_s17 = sand.u32 (!%p198_p0), 1, %s742_s30   ;;  %p224_p1 = scmp.lt.s32.totalorder (!%p198_p0), %s828_s9, 1 }
  0x21   : > { %201 = sbr.rel (%p198_p0) target bundleno = 577 (0x241), region = 40  ;;  %s859_s18 = sshll.u32 (!%p198_p0), %s1011_s17, 3 }
  0x22   : > { %s1029_s1 = sld [smem:[#allocation24_spill]] (!%p198_p0)  ;;  %s869_s26 = smov (!%p198_p0), 0  }
  0x26   : > { %s225_s20 = scalar_select %p224_p1, %s828_s9, 1 }
  0x28   : > { %s525_s21 = sshll.u32 %s225_s20, 3 }
  0x29   : > { %s866_s24 = scalar_lea.vmem %s1029_s1, %s525_s21 }
  0x2a LB: >> { %s1030_s19 = sshll.u32 %s828_s9, 3  ;;  %p237_p2 = scmp.lt.s32.totalorder %s754_s26, 0  ;;  %s754_s26 = sphi %s869_s26, %s234_s26  }
  0x2b   : >> { %s235_s27 = sadd.s32 %s754_s26, %s1030_s19  ;;  %s238_s10 = ssub.s32 0, %s754_s26 }
  0x2c   : >> { %s236_s28 = sld [smem:[#allocation5 + %s235_s27]]  ;;  %s527_s12 = smin.u32 %s754_s26, %s238_s10 }
  0x2d   : >> { %s240_s13 = sand.u32 7, %s527_s12   ;;  %s251_s21 = scalar_lea.vmem [#allocation2], %s754_s26 }
  0x2e   : >> { %s241_s20 = ssub.s32 0, %s240_s13  ;;  %s260_s22 = sshll.u32 %s251_s21, 4  ;;  %s261_s22 = int_to_ptr.vmem [resolvable:$true] %s260_s22 }
  0x2f   : >> { %s1048_s20 = smov (!%p237_p2, %s241_s20), %s240_s13  ;;  %s1017_s10 = scalar_lea.hbm %s1005_s2, 512 }
  0x30   : >> { %p529_p3 = scmp.lt.s32.totalorder %s1048_s20, 0  ;;  %s247_s23 = sadd.s32 8, %s1048_s20 }
  0x32   : >> { %s530_s17 = sshll.u32 %s236_s28, 4  ;;  %s1050_s23 = smov (!%p529_p3, %s247_s23), %s1048_s20 }
  0x33   : >> { %s250_s14 = scalar_lea.hbm %s1005_s2, %s530_s17  ;;  %s252_s0 = scalar_lea.sflag [#allocation3], %s1050_s23 }
  0x34   : >> { %s630_s19 = scalar_lea.hbm %s250_s14, 16  ;;  %p633_p5 = scmp.lt.s32.totalorder %s250_s14, %s1005_s2 }
  0x35   : >> { %p631_p4 = scmp.ne.s32.totalorder %s250_s14, %s630_s19  ;;  %p634_p6 = scmp.lt.s32.totalorder %s1017_s10, %s630_s19 }
  0x37   : >> { %p635_p7 = por %p634_p6, %p633_p5 }
  0x39   : >> { %p636_p8 = pnand %p635_p7, %p631_p4 }
  0x3b   : >> { %639 = shalt.err (!%p636_p8)  }
  0x3c   : >> { %s640_s1 = scalar_lea.vmem %s261_s22, 16  ;;  %s761_s17 = smov [#allocation2]  }
  0x3d   : >> { %p641_p9 = scmp.ne.s32.totalorder %s261_s22, %s640_s1  ;;  %s642_s25 = sshll.u32 %s761_s17, 4  ;;  %s894_s25 = int_to_ptr.vmem [resolvable:$false] %s642_s25 }
  0x3e   : >> { %s1016_s11 = scalar_lea.vmem %s894_s25, 128  ;;  %p645_p12 = scmp.lt.s32.totalorder %s261_s22, %s894_s25 }
  0x3f   : >> { %p646_p13 = scmp.lt.s32.totalorder %s1016_s11, %s640_s1 }
  0x41   : >> { %p647_p0 = por %p646_p13, %p645_p12 }
  0x43   : >> { %p648_p1 = pnand %p647_p0, %p641_p9 }
  0x45   : >> { %651 = shalt.err (!%p648_p1)  }
  0x46   : >> { %263 = dma.hbm_to_vmem [thread:$0]  %s250_s14, 16, %s261_s22, %s252_s0 }
  0x47   : >> { %s234_s26 = sadd.s32 1, %s754_s26  }
  0x48   : >> { %p231_p2 = scmp.ge.s32.totalorder %s234_s26, 8  }
  0x49   : > { %s903_s16 = smov (%p231_p2), 0  }
  0x4a   : > { %233 = sbr.rel (!%p231_p2) target bundleno = 42 (0x2a), region = 115 }
  0x4f LB: >> { %p270_p3 = scmp.lt.s32.totalorder %s758_s16, 0  ;;  %s271_s19 = ssub.s32 0, %s758_s16  ;;  %s758_s16 = sphi %s903_s16, %s269_s16  }
  0x50   : >> { %s531_s28 = smin.u32 %s758_s16, %s271_s19 }
  0x51   : >> { %s273_s0 = sand.u32 7, %s531_s28  }
  0x52   : >> { %s274_s14 = ssub.s32 0, %s273_s0 }
  0x53   : >> { %s1052_s14 = smov (!%p270_p3, %s274_s14), %s273_s0 }
  0x54   : >> { %p533_p4 = scmp.lt.s32.totalorder %s1052_s14, 0  ;;  %s280_s20 = sadd.s32 8, %s1052_s14 }
  0x56   : >> { %s1054_s20 = smov (!%p533_p4, %s280_s20), %s1052_s14 }
  0x57   : >> { %s282_s26 = scalar_lea.sflag [#allocation3], %s1054_s20 }
  0x58   : >> { %730 = dma.done.wait %s282_s26, 16 }
  0x59   : >> { %731 = vsyncadd %s282_s26, 4294967280  ;;  %s912_s22 = sadd.s32 8, %s758_s16  ;;  %s1031_s23 = sshll.u32 %s828_s9, 3 }
  0x5a   : >> { %p563_p5 = scmp.lt.s32.totalorder %s912_s22, 8  ;;  %s291_s27 = sadd.s32 %s1031_s23, %s912_s22 }
  0x5b   : >> { %p293_p6 = scmp.lt.s32.totalorder %s912_s22, 0  ;;  %s294_s13 = ssub.s32 0, %s912_s22 }
  0x5c   : >> { %s554_s12 = scalar_select %p563_p5, [#allocation5], [#allocation14] }
  0x5d   : >> { %s1056_s27 = smov (!%p563_p5, %s291_s27), 0  ;;  %s535_s1 = smin.u32 %s294_s13, %s912_s22 }
  0x5e   : >> { %s292_s21 = sld [smem:[%s554_s12 + %s1056_s27]]  ;;  %s296_s17 = sand.u32 7, %s535_s1  }
  0x5f   : >> { %s478_s19 = scalar_lea.vmem [#allocation2], %s758_s16  ;;  %s297_s0 = ssub.s32 0, %s296_s17 }
  0x60   : >> { %s479_s28 = scalar_lea.vmem %s478_s19, 8 [#allocation2]  ;;  %s1058_s0 = smov (!%p293_p6, %s297_s0), %s296_s17 }
  0x61   : >> { %s316_s14 = sshll.u32 %s479_s28, 4  ;;  %p537_p7 = scmp.lt.s32.totalorder %s1058_s0, 0  ;;  %s317_s14 = int_to_ptr.vmem [resolvable:$true] %s316_s14 }
  0x62   : >> { %s303_s20 = sadd.s32 8, %s1058_s0 }
  0x63   : >> { %s1060_s20 = smov (!%p537_p7, %s303_s20), %s1058_s0 }
  0x64   : >> { %s538_s26 = sshll.u32 %s292_s21, 4  ;;  %s308_s29 = scalar_lea.sflag [#allocation3], %s1060_s20 }
  0x65   : >> { %s306_s10 = scalar_lea.hbm %s1005_s2, %s538_s26  ;;  %s1032_s21 = scalar_lea.hbm %s1005_s2, 512 }
  0x66   : >> { %s652_s8 = scalar_lea.hbm %s306_s10, 16  ;;  %p657_p13 = scmp.lt.s32.totalorder %s306_s10, %s1005_s2 }
  0x67   : >> { %p653_p8 = scmp.ne.s32.totalorder %s306_s10, %s652_s8  ;;  %p658_p0 = scmp.lt.s32.totalorder %s1032_s21, %s652_s8 }
  0x69   : >> { %p654_p9 = pnand %p653_p8, %p563_p5  ;;  %p659_p1 = por %p658_p0, %p657_p13 }
  0x6b   : >> { %p655_p12 = pneg %p654_p9 }
  0x6d   : >> { %p660_p2 = pnand %p659_p1, %p655_p12 }
  0x6f   : >> { %663 = shalt.err (!%p660_p2)  }
  0x70   : >> { %s664_s11 = scalar_lea.vmem %s317_s14, 16  ;;  %p671_p7 = scmp.lt.s32.totalorder %s317_s14, %s894_s25 }
  0x71   : >> { %p665_p3 = scmp.ne.s32.totalorder %s317_s14, %s664_s11  ;;  %s1033_s17 = scalar_lea.vmem %s894_s25, 128 }
  0x72   : >> { %p672_p8 = scmp.lt.s32.totalorder %s1033_s17, %s664_s11 }
  0x73   : >> { %p666_p4 = pnand %p665_p3, %p563_p5 }
  0x74   : >> { %p673_p9 = por %p672_p8, %p671_p7 }
  0x75   : >> { %p667_p6 = pneg %p666_p4 }
  0x77   : >> { %p674_p11 = pnand %p673_p9, %p667_p6 }
  0x79   : >> { %677 = shalt.err (!%p674_p11)  }
  0x7a   : >> { %556 = dma.hbm_to_vmem [thread:$0]  (%p563_p5), %s306_s10, 16, %s317_s14, %s308_s29 }
  0x7b   : >> { %s269_s16 = sadd.s32 1, %s758_s16  }
  0x7c   : >> { %p266_p12 = scmp.ge.s32.totalorder %s269_s16, 8  }
  0x7d   : > { %v323_v0 = vld [vmem:[%s866_s24] sm:$0xff] (%p266_p12)  ;;  %v762_v1 = vmov (%p266_p12), 0   ;;  %v331_v3 = vlaneseq (%p266_p12)  ;;  %vm341_vm2 = vcmask (%p266_p12), 261120   ;;  %s542_s28 = sshll.u32 (%p266_p12), %s828_s9, 7  ;;  %s1034_s0 = scalar_lea.vmem (%p266_p12), [#allocation6], %s859_s18 }
  0x7e   : > { %268 = sbr.rel (!%p266_p12) target bundleno = 79 (0x4f), region = 126  ;;  %615 = vset.pattern.permute.xlu0 (%p266_p12), %v762_v1  ;;  %vm325_vm0 = vcmp.eq.s32.totalorder (%p266_p12), %v323_v0, 0  ;;  %v324_v7 = vld [vmem:[%s1007_s4] sm:$0x3] (%p266_p12)  ;;  %s386_s14 = sshll.u32 (%p266_p12), %s1034_s0, 4  ;;  %s387_s14 = int_to_ptr.vmem [resolvable:$true] %s386_s14 }
  0x7f   : > { %v326_v2 = vsel (%p266_p12), %vm325_vm0, 1, %v762_v1  ;;  %v332_v4 = vshrl.u32 (%p266_p12), %v331_v3, 7  ;;  %v320_v8 = vld [vmem:[#allocation2] sm:$0xff] (%p266_p12)  ;;  %s384_s23 = scalar_lea.hbm (%p266_p12), %s1010_s7, %s542_s28  ;;  %s1035_s27 = smov (%p266_p12), %s1034_s0 }
  0x80   : > { %328 = vperm.xlu0 (%p266_p12), %615, %v326_v2   ;;  %v321_v9 = vld [vmem:[%s1006_s3] sm:$0xff] (%p266_p12)  ;;  %s1036_s12 = sand.u32 (%p266_p12), 1, %s742_s30   ;;  %s678_s1 = scalar_lea.vmem (%p266_p12), %s387_s14, 128 }
  0x81   : > { %v333_v5 = vsub.s32 (%p266_p12), 0, %v332_v4  ;;  %v337_v6 = vsub.s32 (%p266_p12), 1, %v332_v4  ;;  %v322_v12 = vadd.f32 (%p266_p12), %v321_v9, %v320_v8  ;;  %v539_v25 = vld [vmem:[%s1008_s5] ss:$0 sm:$0xff] (%p266_p12)  ;;  %s373_s13 = scalar_lea.sflag (%p266_p12), [#allocation7], %s1036_s12  ;;  %p679_p11 = scmp.ne.s32.totalorder (%p266_p12), %s387_s14, %s678_s1 }
  0x82   : > { %v540_v28 = vld [vmem:[%s1009_s6] ss:$0 sm:$0xff] (%p266_p12)  ;;  %s763_s9 = smov (%p266_p12), [#allocation6]  }
  0x83   : > { %v334_v10 = vrot.slane %v324_v7, %v333_v5  ;;  %v338_v11 = vrot.slane %v324_v7, %v337_v6  ;;  %p680_p5 = pnand %p679_p11, %p845_p10  ;;  %s682_s21 = sshll.u32 %s763_s9, 4  ;;  %s683_s21 = int_to_ptr.vmem [resolvable:$false] %s682_s21 }
  0x84   : > { %s684_s11 = scalar_lea.vmem %s683_s21, 256  ;;  %p685_p0 = scmp.lt.s32.totalorder %s387_s14, %s683_s21 }
  0x85   : > { %p681_p13 = pneg %p680_p5  ;;  %p686_p1 = scmp.lt.s32.totalorder %s684_s11, %s678_s1 }
  0x87   : > { %p687_p2 = por %p686_p1, %p685_p0 }
  0x89   : > { %p688_p3 = pnand %p687_p2, %p681_p13 }
  0xfb   : > { %v329_v13 = vpop.permute.xlu0 %328 }
  0xfc   : > { %vm330_vm1 = vcmp.eq.s32.totalorder %v329_v13, 1 }
  0xfd   : > { %v339_v14 = vsel %vm330_vm1, %v334_v10, %v338_v11 }
  0xfe   : > { %v340_v15 = vadd.f32 %v339_v14, %v322_v12 }
 0x100   : > { %v342_v16 = vsel %vm341_vm2, %v340_v15, 0.0 }
 0x101   : > { %343 = vadd.xlane.f32.xlu0 %v342_v16 }
 0x18a   : > { %v344_v17 = vpop.xlane.xlu0 %343 }
 0x18b   : > { %v345_v18 = vmul.f32 0.03125, %v344_v17 }
 0x18d   : > { %v346_v19 = vsub.f32 %v340_v15, %v345_v18 }
 0x18f   : > { %v347_v20 = vmul.f32 %v346_v19, %v346_v19 }
 0x191   : > { %v348_v21 = vsel %vm341_vm2, %v347_v20, 0.0 }
 0x192   : > { %349 = vadd.xlane.f32.xlu1 %v348_v21 }
 0x21b   : > { %v350_v22 = vpop.xlane.xlu1 %349 }
 0x21c   : > { %v351_v23 = vmul.f32 0.03125, %v350_v22 }
 0x21e   : > { %v352_v24 = vadd.f32 1e-05, %v351_v23 }
 0x220   : > { %616 = vrsqrt.f32 %v352_v24 }
 0x22d   : > { %v617_v26 = vpop.eup %616 }
 0x22e   : > { %v361_v27 = vmul.f32 %v617_v26, %v539_v25 }
 0x230   : > { %v362_v29 = vmul.f32 %v361_v27, %v346_v19 }
 0x232   : > { %v370_v30 = vadd.f32 %v540_v28, %v362_v29 }
 0x234   : > { %371 = vst.msk [vmem:[%s1035_s27] sm:$0xff] %vm341_vm2, %v370_v30 }
 0x235   : > { %691 = shalt.err (!%p688_p3)
}
 0x236   : > { %s692_s17 = scalar_lea.hbm %s384_s23, 128  ;;  %s696_s22 = scalar_lea.hbm %s1010_s7, 256 }
 0x237   : > { %p693_p4 = scmp.ne.s32.totalorder %s384_s23, %s692_s17  ;;  %p697_p8 = scmp.lt.s32.totalorder %s384_s23, %s1010_s7 }
 0x238   : > { %p698_p9 = scmp.lt.s32.totalorder %s696_s22, %s692_s17 }
 0x239   : > { %p694_p6 = pnand %p693_p4, %p845_p10 }
 0x23a   : > { %p699_p12 = por %p698_p9, %p697_p8 }
 0x23b   : > { %p695_p7 = pneg %p694_p6 }
 0x23d   : > { %p700_p11 = pnand %p699_p12, %p695_p7 }
 0x23f   : > { %703 = shalt.err (!%p700_p11)
}
 0x240   : > { %557 = dma.vmem_to_hbm [thread:$0]  (%p845_p10), %s387_s14, 128, %s384_s23, %s373_s13  }
 0x241 PF: > { %s1037_s24 = sld [smem:[#allocation20_spill]] }
 0x242   : > { %s1038_s25 = sld [smem:[#allocation18_spill]] }
 0x243   : > { %s1039_s16 = sld [smem:[#allocation23_spill]] }
 0x247   : > { %p564_p5 = scmp.ge.s32.totalorder %s1037_s24, 2 }
 0x248   : > { %s398_s19 = sand.u32 1, %s1038_s25  }
 0x249   : > { %p1040_p13 = scmp.ne.s32.totalorder %s1039_s16, 0  ;;  %s399_s28 = scalar_lea.sflag [#allocation7], %s398_s19 }
 0x24b   : > { %p560_p0 = pnand %p564_p5, %p1040_p13 }
 0x24d   : > { %p561_p1 = pneg %p560_p0 }
 0x24f   : > { %733 = dma.done.wait (%p561_p1), %s399_s28, 128  }
 0x250   : > { %735 = vsyncadd (%p561_p1), %s399_s28, 4294967168  ;;  %s1041_s8 = sld [smem:[#allocation21_spill]]  ;;  %s1044_s29 = smov %s742_s30 }
 0x251   : > { %s1042_s0 = sld [smem:[#allocation19_spill]] }
 0x252   : > { %s1043_s20 = sld [smem:[#allocation22_spill]] }
 0x256   : > { %p23_p2 = scmp.ge.s32.totalorder %s1041_s8, 4  }
 0x257   : > { %s1045_s30 = smov %s1042_s0 }
 0x258   : > { %s1046_s0 = smov %s1043_s20  ;;  %25 = sbr.rel (!%p23_p2) target bundleno = 18 (0x12), region = 137 }
 0x25d   :  { %404 = vsyncpa [#allocation7], 1 }
 0x25e   :  { %406 = vsyncpa [#allocation7 + $0x1], 1 }
 0x25f   :  { %407 = vsyncmov [#allocation3] }
 0x262   :  { %s408_s15 = vpop.sfrf %407 }
 0x263   :  { %p545_p10 = scmp.ne.s32.totalorder %s408_s15, 0 }
 0x265   :  { %412 = shalt.err (%p545_p10)  }
 0x266   :  { %414 = vsyncmov [#allocation3 + $0x1] }
 0x269   :  { %s415_s14 = vpop.sfrf %414 }
 0x26a   :  { %p546_p3 = scmp.ne.s32.totalorder %s415_s14, 0 }
 0x26c   :  { %419 = shalt.err (%p546_p3)  }
 0x26d   :  { %421 = vsyncmov [#allocation3 + $0x2] }
 0x270   :  { %s422_s26 = vpop.sfrf %421 }
 0x271   :  { %p547_p4 = scmp.ne.s32.totalorder %s422_s26, 0 }
 0x273   :  { %426 = shalt.err (%p547_p4)  }
 0x274   :  { %428 = vsyncmov [#allocation3 + $0x3] }
 0x277   :  { %s429_s23 = vpop.sfrf %428 }
 0x278   :  { %p548_p6 = scmp.ne.s32.totalorder %s429_s23, 0 }
 0x27a   :  { %433 = shalt.err (%p548_p6)  }
 0x27b   :  { %435 = vsyncmov [#allocation3 + $0x4] }
 0x27e   :  { %s436_s27 = vpop.sfrf %435 }
 0x27f   :  { %p549_p7 = scmp.ne.s32.totalorder %s436_s27, 0 }
 0x281   :  { %440 = shalt.err (%p549_p7)  }
 0x282   :  { %442 = vsyncmov [#allocation3 + $0x5] }
 0x285   :  { %s443_s2 = vpop.sfrf %442 }
 0x286   :  { %p550_p8 = scmp.ne.s32.totalorder %s443_s2, 0 }
 0x288   :  { %447 = shalt.err (%p550_p8)  }
 0x289   :  { %449 = vsyncmov [#allocation3 + $0x6] }
 0x28c   :  { %s450_s3 = vpop.sfrf %449 }
 0x28d   :  { %p551_p9 = scmp.ne.s32.totalorder %s450_s3, 0 }
 0x28f   :  { %454 = shalt.err (%p551_p9)  }
 0x290   :  { %456 = vsyncmov [#allocation3 + $0x7] }
 0x293   :  { %s457_s4 = vpop.sfrf %456 }
 0x294   :  { %p552_p12 = scmp.ne.s32.totalorder %s457_s4, 0 }
 0x296   :  { %461 = shalt.err (%p552_p12)  }

</bundles_post_ra>
